<compile_context>
chip_gen: v7x
topology: tpu7x:2x2x1
jax: 0.10.0
libtpu: 0.0.40
codegen_flags: <defaults>
</compile_context>

<pallas_src>
import jax
import jax.numpy as jnp
from jax.experimental import pallas as pl
from jax.experimental.pallas import tpu as pltpu


def _round_up(n, m):
    return ((n + m - 1) // m) * m


def _cdiv(a, b):
    return -(-a // b)


def _vmem_capacity_bytes():
    """Physical per-core VMEM; conservative 64 MiB (v7x) if query fails."""
    try:
        return int(pltpu.get_tpu_info().vmem_capacity_bytes)
    except Exception:
        return 64 << 20


def _is_v5e():
    """v5e's MXU is bf16-native; f32 matmul there is a slow multi-pass."""
    try:
        kind = jax.devices()[0].device_kind.lower()
        return ("v5 lite" in kind) or ("v5e" in kind) or ("v5litepod" in kind)
    except Exception:
        return False


def _residual_block_kernel(x_ref, w_ref, b_ref, o_ref):
    """Fused: out = x + (x @ W + b).  MXU matmul with f32 accumulation.

    x_ref: (tm, Hp) input rows (kept in their original dtype for the residual)
    w_ref: (Hp, tn) weight column tile (possibly bf16)
    b_ref: (1, tn)  f32 bias tile
    o_ref: (tm, tn) output tile
    """
    tn = o_ref.shape[-1]
    x = x_ref[...]
    # Matmul operand is cast to the weight dtype (bf16 path: cast in-kernel,
    # so the residual below still uses the exact f32 x).
    y = jnp.dot(x.astype(w_ref.dtype), w_ref[...],
                preferred_element_type=jnp.float32)

    if x_ref.shape[-1] == tn:          # no N tiling: residual is the full tile
        x_res = x
    else:                              # N tiled: slice the matching columns
        col0 = pl.multiple_of(pl.program_id(1) * tn, 128)
        x_res = x_ref[:, pl.ds(col0, tn)]

    # Single add chain: residual + matmul + bias (all f32), cast once.
    o_ref[...] = (x_res.astype(jnp.float32) + y + b_ref[...]).astype(o_ref.dtype)


def residual_block(x, w, b, *, block_m=1024, bf16_matmul=None, donate_x=False):
    """
    x: (B, L, H)   w: (H, H)   b: (1, H)
    returns (B, L, H) == x + (x @ w + b)
    """
    B, L, H = x.shape
    out_dtype = x.dtype
    M = B * L

    if bf16_matmul is None:
        bf16_matmul = _is_v5e()

    w_dtype = jnp.bfloat16 if bf16_matmul else w.dtype
    x_itemsize = jnp.dtype(x.dtype).itemsize
    w_itemsize = jnp.dtype(w_dtype).itemsize
    out_itemsize = jnp.dtype(out_dtype).itemsize

    # --- lane-dense hidden dim (256-aligned when large: full MXU width) ----
    lane = 256 if H >= 256 else 128
    Hp = _round_up(H, lane)

    # --- per-generation VMEM budget -----------------------------------------
    phys = _vmem_capacity_bytes()
    cap = (phys * 7) // 8          # headroom for Mosaic internal scratch
    usable = (cap * 9) // 10

    # --- N (weight-column) tiling so the weight fits VMEM for large H -------
    max_w_bytes = int(usable * 0.45)
    q = Hp // lane
    tn = Hp
    for d in range(1, q + 1):
        if q % d:
            continue
        tn = Hp // d
        if 2 * Hp * tn * w_itemsize <= max_w_bytes:
            break
    n_n = Hp // tn
    weights_resident = (n_n == 1)   # grid-constant weight/bias blocks

    # --- M (row) tiling ------------------------------------------------------
    row_align = 8 if x_itemsize == 4 else 16   # bf16 packs 2 rows per sublane
    Mp = _round_up(M, row_align)

    def _footprint(tm_):
        return (2 * tm_ * Hp * x_itemsize        # x tiles (double-buffered)
                + 2 * tm_ * tn * out_itemsize    # out tiles (double-buffered)
                + 2 * Hp * tn * w_itemsize       # weight (worst case 2 bufs)
                + 2 * tn * 4)                    # bias

    tm = _round_up(min(block_m, Mp), row_align)
    if Mp >= 2 * row_align:
        # at least 2 row blocks: feeds both v7x TensorCores + enables pipelining
        tm = min(tm, _round_up(_cdiv(Mp, 2), row_align))
    while tm > row_align and _footprint(tm) > usable:
        tm = _round_up(max(row_align, tm // 2), row_align)

    Mp = _round_up(Mp, tm)
    n_m = Mp // tm

    # --- wrapper-side glue: skip pads / casts that are no-ops ---------------
    x2d = x.reshape(M, H)
    pad_m, pad_h = Mp - M, Hp - H
    xp = x2d if (pad_m == 0 and pad_h == 0) else jnp.pad(
        x2d, ((0, pad_m), (0, pad_h)))
    wv = w.astype(w_dtype) if w.dtype != w_dtype else w
    wp = wv if pad_h == 0 else jnp.pad(wv, ((0, pad_h), (0, pad_h)))
    bv = b.astype(jnp.float32)
    bp = bv if pad_h == 0 else jnp.pad(bv, ((0, 0), (0, pad_h)))

    fp = _footprint(tm)
    vmem_limit = int(min(cap, max(16 << 20, (fp * 3) // 2 + (2 << 20))))

    w_reads = 1 if weights_resident else n_m      # W re-fetched per row block when N-tiled
    cost = pl.CostEstimate(
        flops=2 * Mp * Hp * Hp,
        transcendentals=0,
        bytes_accessed=(Mp * Hp * x_itemsize
                        + w_reads * Hp * Hp * w_itemsize
                        + Hp * 4
                        + Mp * Hp * out_itemsize),
    )

    io_aliases = {}
    if donate_x and pad_m == 0 and pad_h == 0 and xp.dtype == out_dtype:
        io_aliases = {0: 0}   # reuse x's HBM buffer for the output

    def _call(single_buffer_w):
        if single_buffer_w:
            # Grid-constant blocks: fetched once, no need for a second buffer.
            w_spec = pl.BlockSpec((Hp, tn), lambda i, j: (0, j),
                                  pipeline_mode=pl.Buffered(1))
            b_spec = pl.BlockSpec((1, tn), lambda i, j: (0, j),
                                  pipeline_mode=pl.Buffered(1))
        else:
            w_spec = pl.BlockSpec((Hp, tn), lambda i, j: (0, j))
            b_spec = pl.BlockSpec((1, tn), lambda i, j: (0, j))
        return pl.pallas_call(
            _residual_block_kernel,
            out_shape=jax.ShapeDtypeStruct((Mp, Hp), out_dtype),
            grid_spec=pltpu.PrefetchScalarGridSpec(
                num_scalar_prefetch=0,
                grid=(n_m, n_n),
                in_specs=[
                    pl.BlockSpec((tm, Hp), lambda i, j: (i, 0)),  # x rows (resident over j)
                    w_spec,                                       # weight column tile
                    b_spec,                                       # bias tile
                ],
                out_specs=pl.BlockSpec((tm, tn), lambda i, j: (i, j)),
            ),
            compiler_params=pltpu.CompilerParams(
                dimension_semantics=("parallel", "parallel"),
                vmem_limit_bytes=vmem_limit,
            ),
            cost_estimate=cost,
            input_output_aliases=io_aliases,
        )(xp, wp, bp)

    try:
        out2d = _call(single_buffer_w=weights_resident)
    except Exception:
        # pipeline_mode=pl.Buffered(1) unsupported on this jax build: fall back
        # to default double-buffering (footprint math already assumed 2 bufs).
        out2d = _call(single_buffer_w=False)

    if pad_m or pad_h:
        out2d = out2d[:M, :H]
    return out2d.reshape(B, L, H)


def residual_block_ref(x, w, b):
    """Pure-JAX reference for correctness check. b: (H,)."""
    return x + (jnp.einsum("blh,hk->blk", x, w) + b)


if __name__ == "__main__":
    key = jax.random.PRNGKey(0)
    kx, kw, kb = jax.random.split(key, 3)

    # --- shape 1: small, lane/sublane friendly ------------------------------
    B, L, H = 2, 8, 32
    x = jax.random.normal(kx, (B, L, H), dtype=jnp.float32)
    w = jax.random.normal(kw, (H, H), dtype=jnp.float32) * 0.1
    b = jax.random.normal(kb, (1, H), dtype=jnp.float32) * 0.1
    ref = residual_block_ref(x, w, b[0])

    out = jax.block_until_ready(residual_block(x, w, b, bf16_matmul=False))
    assert out.shape == (B, L, H)
    assert jnp.allclose(out, ref, atol=1e-4, rtol=1e-4), "mismatch vs reference (f32)"

    # bf16 MXU path: exact f32 residual, bf16 matmul (f32 accumulate).
    out_bf16 = jax.block_until_ready(residual_block(x, w, b, bf16_matmul=True))
    assert jnp.allclose(out_bf16, ref, atol=3e-2, rtol=3e-2), "mismatch vs reference (bf16)"

    # --- shape 2: unaligned rows / hidden dim (exercises pad + slice path) --
    B2, L2, H2 = 1, 5, 48
    x2 = jax.random.normal(kx, (B2, L2, H2), dtype=jnp.float32)
    w2 = jax.random.normal(kw, (H2, H2), dtype=jnp.float32) * 0.1
    b2 = jax.random.normal(kb, (1, H2), dtype=jnp.float32) * 0.1
    ref2 = residual_block_ref(x2, w2, b2[0])
    out2 = jax.block_until_ready(residual_block(x2, w2, b2))  # auto bf16 policy
    assert jnp.allclose(out2, ref2, atol=3e-2, rtol=3e-2), "mismatch vs reference (padded)"

    print("KERNEL_OK")
</pallas_src>

<mosaic_0001>
module attributes {stable_mosaic.version = 11 : i64} {
  func.func @_residual_block_kernel(%arg0: i32, %arg1: i32, %arg2: memref<8x128xf32, #tpu.memory_space<vmem>>, %arg3: memref<128x128xf32, #tpu.memory_space<vmem>>, %arg4: memref<1x128xf32, #tpu.memory_space<vmem>>, %arg5: memref<8x128xf32, #tpu.memory_space<vmem>>) attributes {dimension_semantics = [#tpu.dimension_semantics<parallel>, #tpu.dimension_semantics<parallel>], iteration_bounds = array<i64: 2, 1>, scalar_prefetch = 0 : i64, scratch_operands = 0 : i64, tpu.core_type = #tpu.core_type<tc>, window_params = [{transform_indices = @transform_0, window_bounds = array<i64: 8, 128>}, {pipeline_mode = #tpu.pipeline_mode<synchronous>, transform_indices = @transform_1, window_bounds = array<i64: 128, 128>}, {pipeline_mode = #tpu.pipeline_mode<synchronous>, transform_indices = @transform_2, window_bounds = array<i64: 1, 128>}, {transform_indices = @transform_3, window_bounds = array<i64: 8, 128>}]} {
    %c0 = arith.constant 0 : index
    %c0_0 = arith.constant 0 : index
    %0 = vector.load %arg2[%c0, %c0_0] : memref<8x128xf32, #tpu.memory_space<vmem>>, vector<8x128xf32>
    %c0_1 = arith.constant 0 : index
    %c0_2 = arith.constant 0 : index
    %1 = vector.load %arg3[%c0_1, %c0_2] : memref<128x128xf32, #tpu.memory_space<vmem>>, vector<128x128xf32>
    %cst = arith.constant dense<0.000000e+00> : vector<8x128xf32>
    %2 = tpu.matmul %0, %1, %cst {dimension_numbers = #tpu.dot_dimension_numbers<[1], [0], [0], [1], [0, 0, 1, 1], [], []>} : vector<8x128xf32>, vector<128x128xf32>, vector<8x128xf32> -> vector<8x128xf32>
    %3 = arith.addf %0, %2 : vector<8x128xf32>
    %c0_3 = arith.constant 0 : index
    %c0_4 = arith.constant 0 : index
    %4 = vector.load %arg4[%c0_3, %c0_4] : memref<1x128xf32, #tpu.memory_space<vmem>>, vector<1x128xf32>
    %5 = vector.broadcast %4 : vector<1x128xf32> to vector<8x128xf32>
    %6 = arith.addf %3, %5 : vector<8x128xf32>
    %c0_5 = arith.constant 0 : index
    %c0_6 = arith.constant 0 : index
    %7 = vector.load %arg5[%c0_5, %c0_6] : memref<8x128xf32, #tpu.memory_space<vmem>>, vector<8x128xf32>
    tpu.vector_store %arg5[%c0_5, %c0_6], %6 {strides = array<i32>} : memref<8x128xf32, #tpu.memory_space<vmem>>, vector<8x128xf32>,
    return
  }
  func.func @transform_0(%arg0: i32, %arg1: i32) -> (i32, i32) {
    %c0_i32 = arith.constant 0 : i32
    %c0_i32_0 = arith.constant 0 : i32
    return %arg0, %c0_i32 : i32, i32
  }
  func.func @transform_1(%arg0: i32, %arg1: i32) -> (i32, i32) {
    %c0_i32 = arith.constant 0 : i32
    %c0_i32_0 = arith.constant 0 : i32
    return %c0_i32, %arg1 : i32, i32
  }
  func.func @transform_2(%arg0: i32, %arg1: i32) -> (i32, i32) {
    %c0_i32 = arith.constant 0 : i32
    %c0_i32_0 = arith.constant 0 : i32
    return %c0_i32, %arg1 : i32, i32
  }
  func.func @transform_3(%arg0: i32, %arg1: i32) -> (i32, i32) {
    %c0_i32 = arith.constant 0 : i32
    return %arg0, %arg1 : i32, i32
  }
}

module attributes {stable_mosaic.version = 11 : i64} {
  func.func @_residual_block_kernel(%arg0: i32, %arg1: i32, %arg2: memref<8x128xf32, #tpu.memory_space<vmem>>, %arg3: memref<128x128xf32, #tpu.memory_space<vmem>>, %arg4: memref<1x128xf32, #tpu.memory_space<vmem>>, %arg5: memref<8x128xf32, #tpu.memory_space<vmem>>) attributes {dimension_semantics = [#tpu.dimension_semantics<parallel>, #tpu.dimension_semantics<parallel>], iteration_bounds = array<i64: 2, 1>, scalar_prefetch = 0 : i64, scratch_operands = 0 : i64, tpu.core_type = #tpu.core_type<tc>, window_params = [{transform_indices = @transform_0, window_bounds = array<i64: 8, 128>}, {transform_indices = @transform_1, window_bounds = array<i64: 128, 128>}, {transform_indices = @transform_2, window_bounds = array<i64: 1, 128>}, {transform_indices = @transform_3, window_bounds = array<i64: 8, 128>}]} {
    %c0 = arith.constant 0 : index
    %c0_0 = arith.constant 0 : index
    %0 = vector.load %arg2[%c0, %c0_0] : memref<8x128xf32, #tpu.memory_space<vmem>>, vector<8x128xf32>
    %c0_1 = arith.constant 0 : index
    %c0_2 = arith.constant 0 : index
    %1 = vector.load %arg3[%c0_1, %c0_2] : memref<128x128xf32, #tpu.memory_space<vmem>>, vector<128x128xf32>
    %cst = arith.constant dense<0.000000e+00> : vector<8x128xf32>
    %2 = tpu.matmul %0, %1, %cst {dimension_numbers = #tpu.dot_dimension_numbers<[1], [0], [0], [1], [0, 0, 1, 1], [], []>} : vector<8x128xf32>, vector<128x128xf32>, vector<8x128xf32> -> vector<8x128xf32>
    %3 = arith.addf %0, %2 : vector<8x128xf32>
    %c0_3 = arith.constant 0 : index
    %c0_4 = arith.constant 0 : index
    %4 = vector.load %arg4[%c0_3, %c0_4] : memref<1x128xf32, #tpu.memory_space<vmem>>, vector<1x128xf32>
    %5 = vector.broadcast %4 : vector<1x128xf32> to vector<8x128xf32>
    %6 = arith.addf %3, %5 : vector<8x128xf32>
    %c0_5 = arith.constant 0 : index
    %c0_6 = arith.constant 0 : index
    %7 = vector.load %arg5[%c0_5, %c0_6] : memref<8x128xf32, #tpu.memory_space<vmem>>, vector<8x128xf32>
    tpu.vector_store %arg5[%c0_5, %c0_6], %6 {strides = array<i32>} : memref<8x128xf32, #tpu.memory_space<vmem>>, vector<8x128xf32>,
    return
  }
  func.func @transform_0(%arg0: i32, %arg1: i32) -> (i32, i32) {
    %c0_i32 = arith.constant 0 : i32
    %c0_i32_0 = arith.constant 0 : i32
    return %arg0, %c0_i32 : i32, i32
  }
  func.func @transform_1(%arg0: i32, %arg1: i32) -> (i32, i32) {
    %c0_i32 = arith.constant 0 : i32
    %c0_i32_0 = arith.constant 0 : i32
    return %c0_i32, %arg1 : i32, i32
  }
  func.func @transform_2(%arg0: i32, %arg1: i32) -> (i32, i32) {
    %c0_i32 = arith.constant 0 : i32
    %c0_i32_0 = arith.constant 0 : i32
    return %c0_i32, %arg1 : i32, i32
  }
  func.func @transform_3(%arg0: i32, %arg1: i32) -> (i32, i32) {
    %c0_i32 = arith.constant 0 : i32
    return %arg0, %arg1 : i32, i32
  }
}

</mosaic_0001>

<bundles_post_ra>
// kernel: tpu_custom_call.1
= control target key start
LH: loop header
LB: loop body
LE: loop exit
PB: predicated region body
PF: predicated region fallthrough
CT: control target
= control target key end

     0   :  { %8 = vsyncpa [#allocation3], 0  ;;  %s1020_s0 = inlined_call_operand.hbm [shape: f32[16,128], index: 0, kind: input, shape index: {}]   ;;  %s1021_s1 = inlined_call_operand.hbm [shape: f32[128,128], index: 1, kind: input, shape index: {}]   ;;  %s1022_s2 = inlined_call_operand.vmem [shape: f32[1,128], index: 2, kind: input, shape index: {}]   ;;  %s1023_s3 = inlined_call_operand.hbm [shape: f32[16,128], index: 3, kind: output, shape index: {}]  }
   0x1   :  { %10 = vsyncpa [#allocation3 + $0x1], 0 }
   0x2   :  { %11 = vsyncpa [#allocation6], 0 }
   0x3   :  { %12 = vsyncpa [#allocation4], 0 }
   0x4   :  { %14 = vsyncpa [#allocation4 + $0x1], 0  ;;  %s796_s12 = smov 0   ;;  %s798_s13 = smov 0  }
   0x5   :  { %s800_s14 = smov 0   ;;  %s802_s15 = smov 0  }
   0x6   :  { %s804_s16 = smov 0   ;;  %s806_s17 = smov 0  }
   0x7 LB: > { %s451_s18 = sadd.s32 4294967295, %s766_s17   ;;  %s452_s19 = sadd.s32 4294967294, %s766_s17   ;;  %s766_s17 = sphi %s806_s17, %s20_s17   ;;  %s762_s16 = sphi %s804_s16, %s1047_s16   ;;  %s758_s15 = sphi %s802_s15, %s1046_s15   ;;  %s754_s14 = sphi %s800_s14, %s1045_s14   ;;  %s750_s13 = sphi %s798_s13, %s1044_s13   ;;  %s746_s12 = sphi %s796_s12, %s1043_s12  }
   0x8   : > { %p52_p0 = scmp.ne.s32.totalorder %s750_s13, %s746_s12  ;;  %p830_p1 = scmp.eq.s32.totalorder %s451_s18, 0 }
   0x9   : > { %p834_p2 = scmp.eq.s32.totalorder %s451_s18, 1  ;;  %p136_p3 = scmp.eq.s32.totalorder %s452_s19, 1 }
   0xa   : > { %s1028_s20 = scalar_select %p830_p1, 1, 0 }
   0xb   : > { %s1029_s21 = scalar_select %p834_p2, 1, 0 }
   0xc   : > { %p840_p4 = por %p830_p1, %p52_p0  ;;  %p453_p5 = scmp.ge.s32.totalorder %s766_s17, 1 }
   0xd   : > { %p845_p6 = por %p136_p3, %p52_p0  ;;  %p143_p7 = scmp.lt.s32.totalorder %s766_s17, 3 }
   0xe   : > { %s1030_s22 = scalar_select %p840_p4, 1, 0 }
   0xf   : > { %s1031_s23 = scalar_select %p845_p6, 1, 0 }
  0x10   : > { %p850_p8 = pnand %p453_p5, %p143_p7  ;;  %s768_s25 = smov [#allocation5]  }
  0x11   : > { %s157_s26 = sshll.u32 %s768_s25, 4  ;;  %s32_s28 = sadd.s32 1, %s762_s16  ;;  %s158_s26 = int_to_ptr.vmem [resolvable:$true] %s157_s26 }
  0x12   : > { %s1032_s24 = scalar_select %p850_p8, 1, 0 }
  0x13   : > { %p552_p9 = pneg %p850_p8  ;;  %s622_s4 = scalar_lea.hbm %s1021_s1, 2048 }
  0x14   : > { %p623_p12 = scmp.ne.s32.totalorder %s1021_s1, %s622_s4  ;;  %p629_p5 = scmp.lt.u32.totalorder %s622_s4, %s1021_s1 }
  0x15   : > { %p859_p11 = pnand %p552_p9, %p830_p1 }
  0x17   : > { %p624_p13 = pneg %p859_p11 }
  0x19   : > { %p625_p0 = pnand %p624_p13, %p623_p12 }
  0x1b   : > { %p626_p3 = pneg %p625_p0 }
  0x1d   : > { %p631_p7 = pnand %p629_p5, %p626_p3 }
  0x1f   : > { %634 = shalt.err (!%p631_p7)
}
  0x20   : > { %s635_s9 = scalar_lea.vmem %s158_s26, 2048  ;;  %p643_p1 = scmp.lt.s32.totalorder %s158_s26, %s158_s26 }
  0x21   : > { %p636_p9 = scmp.ne.s32.totalorder %s158_s26, %s635_s9  ;;  %p644_p4 = scmp.lt.s32.totalorder %s635_s9, %s635_s9 }
  0x23   : > { %p638_p10 = pnand %p636_p9, %p624_p13  ;;  %p645_p8 = por %p644_p4, %p643_p1 }
  0x25   : > { %p639_p6 = pneg %p638_p10 }
  0x27   : > { %p646_p2 = pnand %p645_p8, %p639_p6 }
  0x29   : > { %649 = shalt.err (!%p646_p2)
}
  0x2a   : > { %s769_s10 = smov 128   ;;  %s770_s11 = smov 8  }
  0x2b   : > { %555 = dma.hbm_to_vmem [thread:$0]  (!%p859_p11), %s1021_s1, 2048, %s158_s26, [#allocation6], %s769_s10, %s769_s10, %s770_s11  }
  0x2c   : > { %p34_p1 = scmp.ge.s32.totalorder %s32_s28, 2  ;;  %s39_s25 = sadd.s32 1, %s754_s14 }
  0x2d   : > { %p46_p2 = scmp.ne.s32.totalorder %s754_s14, %s750_s13  ;;  %p47_p4 = scmp.eq.s32.totalorder %s766_s17, 0 }
  0x2e   : > { %s1049_s28 = smov (%p34_p1, %s32_s28), 0  ;;  %p1035_p8 = scmp.ne.s32.totalorder %s1029_s21, 0 }
  0x2f   : > { %p886_p6 = por %p47_p4, %p46_p2  ;;  %s36_s27 = ssub.s32 %s762_s16, %s1049_s28 }
  0x30   : > { %p892_p10 = por %p1035_p8, %p46_p2  ;;  %p565_p12 = scmp.lt.s32.totalorder %s766_s17, 2 }
  0x31   : > { %p37_p11 = scmp.eq.s32.totalorder %s36_s27, 0  ;;  %s177_s26 = sand.u32 1, %s754_s14  }
  0x32   : > { %s457_s4 = sshll.u32 %s177_s26, 3  ;;  %s458_s6 = sshll.u32 %s762_s16, 7 }
  0x33   : > { %s901_s5 = scalar_select %p37_p11, %s754_s14, %s39_s25  }
  0x34   : > { %s907_s9 = scalar_lea.hbm %s1020_s0, %s458_s6  ;;  %s181_s21 = scalar_lea.vmem [#allocation2], %s457_s4 }
  0x35   : > { %s188_s10 = sshll.u32 %s181_s21, 4  ;;  %p913_p13 = pnand %p565_p12, %p886_p6  ;;  %s909_s10 = int_to_ptr.vmem [resolvable:$true] %s188_s10 }
  0x36   : > { %s178_s18 = scalar_lea.sflag [#allocation3], %s177_s26  ;;  %s650_s19 = scalar_lea.hbm %s907_s9, 128 }
  0x37   : > { %p651_p0 = scmp.ne.s32.totalorder %s907_s9, %s650_s19  ;;  %p652_p3 = pneg %p913_p13 }
  0x38   : > { %s655_s4 = scalar_lea.hbm %s1020_s0, 256  ;;  %p656_p9 = scmp.lt.u32.totalorder %s907_s9, %s1020_s0 }
  0x39   : > { %p653_p5 = pnand %p652_p3, %p651_p0  ;;  %p657_p1 = scmp.lt.u32.totalorder %s655_s4, %s650_s19 }
  0x3a   : > { %p659_p4 = scmp.lt.u32.totalorder %s650_s19, %s907_s9 }
  0x3b   : > { %p654_p7 = pneg %p653_p5  ;;  %p658_p2 = por %p657_p1, %p656_p9 }
  0x3d   : > { %p660_p6 = por %p659_p4, %p658_p2 }
  0x3f   : > { %p661_p8 = pnand %p660_p6, %p654_p7 }
  0x41   : > { %664 = shalt.err (!%p661_p8)
}
  0x42   : > { %s665_s26 = scalar_lea.vmem %s909_s10, 128  ;;  %s771_s7 = smov [#allocation2]  }
  0x43   : > { %p666_p12 = scmp.ne.s32.totalorder %s909_s10, %s665_s26  ;;  %s670_s8 = sshll.u32 %s771_s7, 4  ;;  %s671_s8 = int_to_ptr.vmem [resolvable:$false] %s670_s8 }
  0x44   : > { %s672_s21 = scalar_lea.vmem %s671_s8, 256  ;;  %p673_p5 = scmp.lt.s32.totalorder %s909_s10, %s671_s8 }
  0x45   : > { %p668_p11 = pnand %p666_p12, %p652_p3  ;;  %p674_p9 = scmp.lt.s32.totalorder %s672_s21, %s665_s26 }
  0x47   : > { %p669_p0 = pneg %p668_p11  ;;  %p675_p1 = por %p674_p9, %p673_p5 }
  0x49   : > { %p676_p2 = pnand %p675_p1, %p669_p0 }
  0x4b   : > { %679 = shalt.err (!%p676_p2)
}
  0x4c   : > { %559 = dma.hbm_to_vmem [thread:$0]  (!%p913_p13), %s907_s9, 128, %s909_s10, %s178_s18  }
  0x4d   : > { %p1038_p7 = scmp.ne.s32.totalorder %s1032_s24, 0 }
  0x4e   : > { %s945_s19 = sand.u32 (!%p1038_p7), 1, %s750_s13   ;;  %p1039_p3 = scmp.ne.s32.totalorder (!%p1038_p7), %s1030_s22, 0 }
  0x4f   : > { %197 = sbr.rel (%p1038_p7) target bundleno = 355 (0x163), region = 32  ;;  %s460_s25 = sshll.u32 (!%p1038_p7), %s945_s19, 3 }
  0x50   : > { %s200_s27 = scalar_lea.sflag (!%p1038_p7), [#allocation3], %s945_s19  ;;  %s951_s4 = scalar_lea.vmem (!%p1038_p7), [#allocation2], %s460_s25 }
  0x56   : > { %733 = dma.done.wait (%p1039_p3), %s200_s27, 128  }
  0x57   : > { %735 = vsyncadd (%p1039_p3), %s200_s27, 4294967168  ;;  %p1040_p13 = scmp.ne.s32.totalorder %s1028_s20, 0 }
  0x59   : > { %737 = dma.done.wait (%p1040_p13), [#allocation6], 2048  }
  0x5a   : > { %739 = vsyncadd (%p1040_p13), [#allocation6], 4294965248  ;;  %v772_v0 = vmov 0.0|0.0   ;;  %vm773_vm0 = vmmov 0   ;;  %v774_v1 = vmov 0.0   ;;  %v237_v2 = vld [vmem:[#allocation5] sm:$0xff] }
  0x5b   : > { %520 = vmatprep.subr.bf16.mxu0 %v772_v0  ;;  %517 = vmatprep.mubr.msk.f32.mxu0 %vm773_vm0, %v774_v1  ;;  %v238_v3 = vld [vmem:[#allocation5 + $0x8] sm:$0xff]  ;;  %v239_v4 = vld [vmem:[#allocation5 + $0x10] sm:$0xff]  ;;  %v240_v6 = vld [vmem:[#allocation5 + $0x18] sm:$0xff]  ;;  %s465_s24 = sshll.u32 %s758_s15, 7  ;;  %s232_s9 = scalar_lea.vmem [#allocation7], %s460_s25 }
  0x5c   : > { %v521_v5 = vpack.c.bf16 %v238_v3, %v237_v2  ;;  %v524_v7 = vpack.c.bf16 %v240_v6, %v239_v4  ;;  %v241_v8 = vld [vmem:[#allocation5 + $0x20] sm:$0xff]  ;;  %v242_v9 = vld [vmem:[#allocation5 + $0x28] sm:$0xff]  ;;  %v243_v11 = vld [vmem:[#allocation5 + $0x30] sm:$0xff]  ;;  %s348_s10 = sshll.u32 %s232_s9, 4  ;;  %s971_s29 = scalar_lea.hbm %s1023_s3, %s465_s24  ;;  %s973_s10 = int_to_ptr.vmem [resolvable:$true] %s348_s10 }
  0x5d   : > { %v527_v10 = vpack.c.bf16 %v242_v9, %v241_v8  ;;  %v244_v12 = vld [vmem:[#allocation5 + $0x38] sm:$0xff]  ;;  %v245_v14 = vld [vmem:[#allocation5 + $0x40] sm:$0xff]  ;;  %v246_v15 = vld [vmem:[#allocation5 + $0x48] sm:$0xff]  ;;  %s334_s6 = scalar_lea.sflag [#allocation4], %s945_s19  ;;  %s680_s26 = scalar_lea.vmem %s973_s10, 128 }
  0x5e   : > { %522 = vmatpush3.bf16.msra.mxu0 %v521_v5  ;;  %v530_v13 = vpack.c.bf16 %v244_v12, %v243_v11  ;;  %v533_v16 = vpack.c.bf16 %v246_v15, %v245_v14  ;;  %v247_v17 = vld [vmem:[#allocation5 + $0x50] sm:$0xff]  ;;  %v248_v18 = vld [vmem:[#allocation5 + $0x58] sm:$0xff]  ;;  %v249_v20 = vld [vmem:[#allocation5 + $0x60] sm:$0xff]  ;;  %p681_p4 = scmp.ne.s32.totalorder %s973_s10, %s680_s26  ;;  %s775_s15 = smov [#allocation7]  }
  0x5f   : > { %523 = vmatprep.subr.bf16.mxu0 %v772_v0  ;;  %v536_v19 = vpack.c.bf16 %v248_v18, %v247_v17  ;;  %v250_v21 = vld [vmem:[#allocation5 + $0x68] sm:$0xff]  ;;  %v251_v23 = vld [vmem:[#allocation5 + $0x70] sm:$0xff]  ;;  %v252_v24 = vld [vmem:[#allocation5 + $0x78] sm:$0xff]  ;;  %s684_s7 = sshll.u32 %s775_s15, 4  ;;  %s685_s7 = int_to_ptr.vmem [resolvable:$false] %s684_s7 }
  0x60   : > { %v539_v22 = vpack.c.bf16 %v250_v21, %v249_v20  ;;  %v542_v25 = vpack.c.bf16 %v252_v24, %v251_v23  ;;  %v236_v26 = vld [vmem:[%s951_s4] sm:$0xff]  ;;  %p682_p6 = pnand %p681_p4, %p892_p10  ;;  %s686_s8 = scalar_lea.vmem %s685_s7, 256 }
  0x61   : > { %v463_v28 = vld [vmem:[%s1022_s2] ss:$0 sm:$0xff]  ;;  %p687_p12 = scmp.lt.s32.totalorder %s973_s10, %s685_s7  ;;  %p688_p11 = scmp.lt.s32.totalorder %s686_s8, %s680_s26 }
  0x62   : > { %525 = vmatpush3.bf16.msra.mxu0 %v524_v7  ;;  %p683_p8 = pneg %p682_p6 }
  0x63   : > { %526 = vmatprep.subr.bf16.mxu0 %v772_v0  ;;  %p689_p0 = por %p688_p11, %p687_p12 }
  0x65   : > { %p690_p5 = pnand %p689_p0, %p683_p8 }
  0x66   : > { %528 = vmatpush3.bf16.msra.mxu0 %v527_v10 }
  0x67   : > { %529 = vmatprep.subr.bf16.mxu0 %v772_v0 }
  0x6a   : > { %531 = vmatpush3.bf16.msra.mxu0 %v530_v13 }
  0x6b   : > { %532 = vmatprep.subr.bf16.mxu0 %v772_v0 }
  0x6e   : > { %534 = vmatpush3.bf16.msra.mxu0 %v533_v16 }
  0x6f   : > { %535 = vmatprep.subr.bf16.mxu0 %v772_v0 }
  0x72   : > { %537 = vmatpush3.bf16.msra.mxu0 %v536_v19 }
  0x73   : > { %538 = vmatprep.subr.bf16.mxu0 %v772_v0 }
  0x76   : > { %540 = vmatpush3.bf16.msra.mxu0 %v539_v22 }
  0x77   : > { %541 = vmatprep.subr.bf16.mxu0 %v772_v0 }
  0x7a   : > { %543 = vmatpush3.bf16.msra.mxu0 %v542_v25 }
  0x7d   : > { %518 = vmatmul.mubr.f32.vlgmr.msra.gmra.mrb[0].mxu0 %v236_v26 }
 0x150   : > { %v319_v27 = vpop.f32.mrb[0].mxu0 }
 0x151   : > { %v323_v29 = vadd.f32 %v319_v27, %v236_v26  ;;  %v519_v30 = vpop.f32.mrb[1].mxu0 }
 0x153   : > { %v331_v31 = vadd.f32 %v463_v28, %v323_v29 }
 0x155   : > { %332 = vst [vmem:[%s232_s9] sm:$0xff] %v331_v31 }
 0x156   : > { %693 = shalt.err (!%p690_p5)
}
 0x157   : > { %s694_s21 = scalar_lea.hbm %s971_s29, 128  ;;  %s698_s27 = scalar_lea.hbm %s1023_s3, 256 }
 0x158   : > { %p695_p9 = scmp.ne.s32.totalorder %s971_s29, %s694_s21  ;;  %p699_p7 = scmp.lt.u32.totalorder %s971_s29, %s1023_s3 }
 0x159   : > { %p700_p3 = scmp.lt.u32.totalorder %s698_s27, %s694_s21  ;;  %p702_p4 = scmp.lt.u32.totalorder %s694_s21, %s971_s29 }
 0x15a   : > { %p696_p1 = pnand %p695_p9, %p892_p10 }
 0x15b   : > { %p701_p13 = por %p700_p3, %p699_p7 }
 0x15c   : > { %p697_p2 = pneg %p696_p1 }
 0x15d   : > { %p703_p6 = por %p702_p4, %p701_p13 }
 0x15f   : > { %p704_p8 = pnand %p703_p6, %p697_p2 }
 0x161   : > { %707 = shalt.err (!%p704_p8)
}
 0x162   : > { %550 = dma.vmem_to_hbm [thread:$0]  (%p892_p10), %s973_s10, 128, %s971_s29, %s334_s6  }
 0x163 PF: > { %s360_s22 = sand.u32 1, %s746_s12   ;;  %p1041_p12 = scmp.ne.s32.totalorder %s1031_s23, 0 }
 0x164   : > { %p1042_p11 = scmp.ge.s32.totalorder %s766_s17, 2  ;;  %s361_s24 = scalar_lea.sflag [#allocation4], %s360_s22 }
 0x166   : > { %p561_p0 = pnand %p1042_p11, %p1041_p12 }
 0x168   : > { %741 = dma.done.wait (!%p561_p0), %s361_s24, 128  }
 0x169   : > { %743 = vsyncadd (!%p561_p0), %s361_s24, 4294967168  ;;  %s20_s17 = sadd.s32 1, %s766_s17   ;;  %s1043_s12 = smov %s750_s13 }
 0x16a   : > { %p17_p5 = scmp.ge.s32.totalorder %s20_s17, 4   ;;  %s1044_s13 = smov %s754_s14 }
 0x16b   : > { %s1045_s14 = smov %s901_s5  ;;  %s1046_s15 = smov %s762_s16 }
 0x16c   : > { %s1047_s16 = smov %s1049_s28  ;;  %19 = sbr.rel (!%p17_p5) target bundleno = 7 (0x7), region = 85 }
 0x173   :  { %366 = vsyncpa [#allocation3], 1 }
 0x174   :  { %368 = vsyncpa [#allocation3 + $0x1], 1 }
 0x175   :  { %369 = vsyncpa [#allocation6], 1 }
 0x176   :  { %370 = vsyncpa [#allocation4], 1 }
 0x177   :  { %372 = vsyncpa [#allocation4 + $0x1], 1 }

// kernel: tpu_custom_call.1
= control target key start
LH: loop header
LB: loop body
LE: loop exit
PB: predicated region body
PF: predicated region fallthrough
CT: control target
= control target key end

     0   :  { %8 = vsyncpa [#allocation3], 0  ;;  %s1020_s0 = inlined_call_operand.hbm [shape: f32[16,128], index: 0, kind: input, shape index: {}]   ;;  %s1021_s1 = inlined_call_operand.hbm [shape: f32[128,128], index: 1, kind: input, shape index: {}]   ;;  %s1022_s2 = inlined_call_operand.vmem [shape: f32[1,128], index: 2, kind: input, shape index: {}]   ;;  %s1023_s3 = inlined_call_operand.hbm [shape: f32[16,128], index: 3, kind: output, shape index: {}]  }
   0x1   :  { %10 = vsyncpa [#allocation3 + $0x1], 0 }
   0x2   :  { %11 = vsyncpa [#allocation6], 0 }
   0x3   :  { %12 = vsyncpa [#allocation4], 0 }
   0x4   :  { %14 = vsyncpa [#allocation4 + $0x1], 0  ;;  %s796_s12 = smov 0   ;;  %s798_s13 = smov 0  }
   0x5   :  { %s800_s14 = smov 0   ;;  %s802_s15 = smov 0  }
   0x6   :  { %s804_s16 = smov 0   ;;  %s806_s17 = smov 0  }
   0x7 LB: > { %s451_s18 = sadd.s32 4294967295, %s766_s17   ;;  %s452_s19 = sadd.s32 4294967294, %s766_s17   ;;  %s766_s17 = sphi %s806_s17, %s20_s17   ;;  %s762_s16 = sphi %s804_s16, %s1047_s16   ;;  %s758_s15 = sphi %s802_s15, %s1046_s15   ;;  %s754_s14 = sphi %s800_s14, %s1045_s14   ;;  %s750_s13 = sphi %s798_s13, %s1044_s13   ;;  %s746_s12 = sphi %s796_s12, %s1043_s12  }
   0x8   : > { %p52_p0 = scmp.ne.s32.totalorder %s750_s13, %s746_s12  ;;  %p830_p1 = scmp.eq.s32.totalorder %s451_s18, 0 }
   0x9   : > { %p834_p2 = scmp.eq.s32.totalorder %s451_s18, 1  ;;  %p136_p3 = scmp.eq.s32.totalorder %s452_s19, 1 }
   0xa   : > { %s1028_s20 = scalar_select %p830_p1, 1, 0 }
   0xb   : > { %s1029_s21 = scalar_select %p834_p2, 1, 0 }
   0xc   : > { %p840_p4 = por %p830_p1, %p52_p0  ;;  %p453_p5 = scmp.ge.s32.totalorder %s766_s17, 1 }
   0xd   : > { %p845_p6 = por %p136_p3, %p52_p0  ;;  %p143_p7 = scmp.lt.s32.totalorder %s766_s17, 3 }
   0xe   : > { %s1030_s22 = scalar_select %p840_p4, 1, 0 }
   0xf   : > { %s1031_s23 = scalar_select %p845_p6, 1, 0 }
  0x10   : > { %p850_p8 = pnand %p453_p5, %p143_p7  ;;  %s768_s25 = smov [#allocation5]  }
  0x11   : > { %s157_s26 = sshll.u32 %s768_s25, 4  ;;  %s32_s28 = sadd.s32 1, %s762_s16  ;;  %s158_s26 = int_to_ptr.vmem [resolvable:$true] %s157_s26 }
  0x12   : > { %s1032_s24 = scalar_select %p850_p8, 1, 0 }
  0x13   : > { %p552_p9 = pneg %p850_p8  ;;  %s622_s4 = scalar_lea.hbm %s1021_s1, 2048 }
  0x14   : > { %p623_p12 = scmp.ne.s32.totalorder %s1021_s1, %s622_s4  ;;  %p629_p5 = scmp.lt.u32.totalorder %s622_s4, %s1021_s1 }
  0x15   : > { %p859_p11 = pnand %p552_p9, %p830_p1 }
  0x17   : > { %p624_p13 = pneg %p859_p11 }
  0x19   : > { %p625_p0 = pnand %p624_p13, %p623_p12 }
  0x1b   : > { %p626_p3 = pneg %p625_p0 }
  0x1d   : > { %p631_p7 = pnand %p629_p5, %p626_p3 }
  0x1f   : > { %634 = shalt.err (!%p631_p7)
}
  0x20   : > { %s635_s9 = scalar_lea.vmem %s158_s26, 2048  ;;  %p643_p1 = scmp.lt.s32.totalorder %s158_s26, %s158_s26 }
  0x21   : > { %p636_p9 = scmp.ne.s32.totalorder %s158_s26, %s635_s9  ;;  %p644_p4 = scmp.lt.s32.totalorder %s635_s9, %s635_s9 }
  0x23   : > { %p638_p10 = pnand %p636_p9, %p624_p13  ;;  %p645_p8 = por %p644_p4, %p643_p1 }
  0x25   : > { %p639_p6 = pneg %p638_p10 }
  0x27   : > { %p646_p2 = pnand %p645_p8, %p639_p6 }
  0x29   : > { %649 = shalt.err (!%p646_p2)
}
  0x2a   : > { %s769_s10 = smov 128   ;;  %s770_s11 = smov 8  }
  0x2b   : > { %555 = dma.hbm_to_vmem [thread:$0]  (!%p859_p11), %s1021_s1, 2048, %s158_s26, [#allocation6], %s769_s10, %s769_s10, %s770_s11  }
  0x2c   : > { %p34_p1 = scmp.ge.s32.totalorder %s32_s28, 2  ;;  %s39_s25 = sadd.s32 1, %s754_s14 }
  0x2d   : > { %p46_p2 = scmp.ne.s32.totalorder %s754_s14, %s750_s13  ;;  %p47_p4 = scmp.eq.s32.totalorder %s766_s17, 0 }
  0x2e   : > { %s1049_s28 = smov (%p34_p1, %s32_s28), 0  ;;  %p1035_p8 = scmp.ne.s32.totalorder %s1029_s21, 0 }
  0x2f   : > { %p886_p6 = por %p47_p4, %p46_p2  ;;  %s36_s27 = ssub.s32 %s762_s16, %s1049_s28 }
  0x30   : > { %p892_p10 = por %p1035_p8, %p46_p2  ;;  %p565_p12 = scmp.lt.s32.totalorder %s766_s17, 2 }
  0x31   : > { %p37_p11 = scmp.eq.s32.totalorder %s36_s27, 0  ;;  %s177_s26 = sand.u32 1, %s754_s14  }
  0x32   : > { %s457_s4 = sshll.u32 %s177_s26, 3  ;;  %s458_s6 = sshll.u32 %s762_s16, 7 }
  0x33   : > { %s901_s5 = scalar_select %p37_p11, %s754_s14, %s39_s25  }
  0x34   : > { %s907_s9 = scalar_lea.hbm %s1020_s0, %s458_s6  ;;  %s181_s21 = scalar_lea.vmem [#allocation2], %s457_s4 }
  0x35   : > { %s188_s10 = sshll.u32 %s181_s21, 4  ;;  %p913_p13 = pnand %p565_p12, %p886_p6  ;;  %s909_s10 = int_to_ptr.vmem [resolvable:$true] %s188_s10 }
  0x36   : > { %s178_s18 = scalar_lea.sflag [#allocation3], %s177_s26  ;;  %s650_s19 = scalar_lea.hbm %s907_s9, 128 }
  0x37   : > { %p651_p0 = scmp.ne.s32.totalorder %s907_s9, %s650_s19  ;;  %p652_p3 = pneg %p913_p13 }
  0x38   : > { %s655_s4 = scalar_lea.hbm %s1020_s0, 256  ;;  %p656_p9 = scmp.lt.u32.totalorder %s907_s9, %s1020_s0 }
  0x39   : > { %p653_p5 = pnand %p652_p3, %p651_p0  ;;  %p657_p1 = scmp.lt.u32.totalorder %s655_s4, %s650_s19 }
  0x3a   : > { %p659_p4 = scmp.lt.u32.totalorder %s650_s19, %s907_s9 }
  0x3b   : > { %p654_p7 = pneg %p653_p5  ;;  %p658_p2 = por %p657_p1, %p656_p9 }
  0x3d   : > { %p660_p6 = por %p659_p4, %p658_p2 }
  0x3f   : > { %p661_p8 = pnand %p660_p6, %p654_p7 }
  0x41   : > { %664 = shalt.err (!%p661_p8)
}
  0x42   : > { %s665_s26 = scalar_lea.vmem %s909_s10, 128  ;;  %s771_s7 = smov [#allocation2]  }
  0x43   : > { %p666_p12 = scmp.ne.s32.totalorder %s909_s10, %s665_s26  ;;  %s670_s8 = sshll.u32 %s771_s7, 4  ;;  %s671_s8 = int_to_ptr.vmem [resolvable:$false] %s670_s8 }
  0x44   : > { %s672_s21 = scalar_lea.vmem %s671_s8, 256  ;;  %p673_p5 = scmp.lt.s32.totalorder %s909_s10, %s671_s8 }
  0x45   : > { %p668_p11 = pnand %p666_p12, %p652_p3  ;;  %p674_p9 = scmp.lt.s32.totalorder %s672_s21, %s665_s26 }
  0x47   : > { %p669_p0 = pneg %p668_p11  ;;  %p675_p1 = por %p674_p9, %p673_p5 }
  0x49   : > { %p676_p2 = pnand %p675_p1, %p669_p0 }
  0x4b   : > { %679 = shalt.err (!%p676_p2)
}
  0x4c   : > { %559 = dma.hbm_to_vmem [thread:$0]  (!%p913_p13), %s907_s9, 128, %s909_s10, %s178_s18  }
  0x4d   : > { %p1038_p7 = scmp.ne.s32.totalorder %s1032_s24, 0 }
  0x4e   : > { %s945_s19 = sand.u32 (!%p1038_p7), 1, %s750_s13   ;;  %p1039_p3 = scmp.ne.s32.totalorder (!%p1038_p7), %s1030_s22, 0 }
  0x4f   : > { %197 = sbr.rel (%p1038_p7) target bundleno = 355 (0x163), region = 32  ;;  %s460_s25 = sshll.u32 (!%p1038_p7), %s945_s19, 3 }
  0x50   : > { %s200_s27 = scalar_lea.sflag (!%p1038_p7), [#allocation3], %s945_s19  ;;  %s951_s4 = scalar_lea.vmem (!%p1038_p7), [#allocation2], %s460_s25 }
  0x56   : > { %733 = dma.done.wait (%p1039_p3), %s200_s27, 128  }
  0x57   : > { %735 = vsyncadd (%p1039_p3), %s200_s27, 4294967168  ;;  %p1040_p13 = scmp.ne.s32.totalorder %s1028_s20, 0 }
  0x59   : > { %737 = dma.done.wait (%p1040_p13), [#allocation6], 2048  }
  0x5a   : > { %739 = vsyncadd (%p1040_p13), [#allocation6], 4294965248  ;;  %v772_v0 = vmov 0.0|0.0   ;;  %vm773_vm0 = vmmov 0   ;;  %v774_v1 = vmov 0.0   ;;  %v237_v2 = vld [vmem:[#allocation5] sm:$0xff] }
  0x5b   : > { %520 = vmatprep.subr.bf16.mxu0 %v772_v0  ;;  %517 = vmatprep.mubr.msk.f32.mxu0 %vm773_vm0, %v774_v1  ;;  %v238_v3 = vld [vmem:[#allocation5 + $0x8] sm:$0xff]  ;;  %v239_v4 = vld [vmem:[#allocation5 + $0x10] sm:$0xff]  ;;  %v240_v6 = vld [vmem:[#allocation5 + $0x18] sm:$0xff]  ;;  %s465_s24 = sshll.u32 %s758_s15, 7  ;;  %s232_s9 = scalar_lea.vmem [#allocation7], %s460_s25 }
  0x5c   : > { %v521_v5 = vpack.c.bf16 %v238_v3, %v237_v2  ;;  %v524_v7 = vpack.c.bf16 %v240_v6, %v239_v4  ;;  %v241_v8 = vld [vmem:[#allocation5 + $0x20] sm:$0xff]  ;;  %v242_v9 = vld [vmem:[#allocation5 + $0x28] sm:$0xff]  ;;  %v243_v11 = vld [vmem:[#allocation5 + $0x30] sm:$0xff]  ;;  %s348_s10 = sshll.u32 %s232_s9, 4  ;;  %s971_s29 = scalar_lea.hbm %s1023_s3, %s465_s24  ;;  %s973_s10 = int_to_ptr.vmem [resolvable:$true] %s348_s10 }
  0x5d   : > { %v527_v10 = vpack.c.bf16 %v242_v9, %v241_v8  ;;  %v244_v12 = vld [vmem:[#allocation5 + $0x38] sm:$0xff]  ;;  %v245_v14 = vld [vmem:[#allocation5 + $0x40] sm:$0xff]  ;;  %v246_v15 = vld [vmem:[#allocation5 + $0x48] sm:$0xff]  ;;  %s334_s6 = scalar_lea.sflag [#allocation4], %s945_s19  ;;  %s680_s26 = scalar_lea.vmem %s973_s10, 128 }
  0x5e   : > { %522 = vmatpush3.bf16.msra.mxu0 %v521_v5  ;;  %v530_v13 = vpack.c.bf16 %v244_v12, %v243_v11  ;;  %v533_v16 = vpack.c.bf16 %v246_v15, %v245_v14  ;;  %v247_v17 = vld [vmem:[#allocation5 + $0x50] sm:$0xff]  ;;  %v248_v18 = vld [vmem:[#allocation5 + $0x58] sm:$0xff]  ;;  %v249_v20 = vld [vmem:[#allocation5 + $0x60] sm:$0xff]  ;;  %p681_p4 = scmp.ne.s32.totalorder %s973_s10, %s680_s26  ;;  %s775_s15 = smov [#allocation7]  }
  0x5f   : > { %523 = vmatprep.subr.bf16.mxu0 %v772_v0  ;;  %v536_v19 = vpack.c.bf16 %v248_v18, %v247_v17  ;;  %v250_v21 = vld [vmem:[#allocation5 + $0x68] sm:$0xff]  ;;  %v251_v23 = vld [vmem:[#allocation5 + $0x70] sm:$0xff]  ;;  %v252_v24 = vld [vmem:[#allocation5 + $0x78] sm:$0xff]  ;;  %s684_s7 = sshll.u32 %s775_s15, 4  ;;  %s685_s7 = int_to_ptr.vmem [resolvable:$false] %s684_s7 }
  0x60   : > { %v539_v22 = vpack.c.bf16 %v250_v21, %v249_v20  ;;  %v542_v25 = vpack.c.bf16 %v252_v24, %v251_v23  ;;  %v236_v26 = vld [vmem:[%s951_s4] sm:$0xff]  ;;  %p682_p6 = pnand %p681_p4, %p892_p10  ;;  %s686_s8 = scalar_lea.vmem %s685_s7, 256 }
  0x61   : > { %v463_v28 = vld [vmem:[%s1022_s2] ss:$0 sm:$0xff]  ;;  %p687_p12 = scmp.lt.s32.totalorder %s973_s10, %s685_s7  ;;  %p688_p11 = scmp.lt.s32.totalorder %s686_s8, %s680_s26 }
  0x62   : > { %525 = vmatpush3.bf16.msra.mxu0 %v524_v7  ;;  %p683_p8 = pneg %p682_p6 }
  0x63   : > { %526 = vmatprep.subr.bf16.mxu0 %v772_v0  ;;  %p689_p0 = por %p688_p11, %p687_p12 }
  0x65   : > { %p690_p5 = pnand %p689_p0, %p683_p8 }
  0x66   : > { %528 = vmatpush3.bf16.msra.mxu0 %v527_v10 }
  0x67   : > { %529 = vmatprep.subr.bf16.mxu0 %v772_v0 }
  0x6a   : > { %531 = vmatpush3.bf16.msra.mxu0 %v530_v13 }
  0x6b   : > { %532 = vmatprep.subr.bf16.mxu0 %v772_v0 }
  0x6e   : > { %534 = vmatpush3.bf16.msra.mxu0 %v533_v16 }
  0x6f   : > { %535 = vmatprep.subr.bf16.mxu0 %v772_v0 }
  0x72   : > { %537 = vmatpush3.bf16.msra.mxu0 %v536_v19 }
  0x73   : > { %538 = vmatprep.subr.bf16.mxu0 %v772_v0 }
  0x76   : > { %540 = vmatpush3.bf16.msra.mxu0 %v539_v22 }
  0x77   : > { %541 = vmatprep.subr.bf16.mxu0 %v772_v0 }
  0x7a   : > { %543 = vmatpush3.bf16.msra.mxu0 %v542_v25 }
  0x7d   : > { %518 = vmatmul.mubr.f32.vlgmr.msra.gmra.mrb[0].mxu0 %v236_v26 }
 0x150   : > { %v319_v27 = vpop.f32.mrb[0].mxu0 }
 0x151   : > { %v323_v29 = vadd.f32 %v319_v27, %v236_v26  ;;  %v519_v30 = vpop.f32.mrb[1].mxu0 }
 0x153   : > { %v331_v31 = vadd.f32 %v463_v28, %v323_v29 }
 0x155   : > { %332 = vst [vmem:[%s232_s9] sm:$0xff] %v331_v31 }
 0x156   : > { %693 = shalt.err (!%p690_p5)
}
 0x157   : > { %s694_s21 = scalar_lea.hbm %s971_s29, 128  ;;  %s698_s27 = scalar_lea.hbm %s1023_s3, 256 }
 0x158   : > { %p695_p9 = scmp.ne.s32.totalorder %s971_s29, %s694_s21  ;;  %p699_p7 = scmp.lt.u32.totalorder %s971_s29, %s1023_s3 }
 0x159   : > { %p700_p3 = scmp.lt.u32.totalorder %s698_s27, %s694_s21  ;;  %p702_p4 = scmp.lt.u32.totalorder %s694_s21, %s971_s29 }
 0x15a   : > { %p696_p1 = pnand %p695_p9, %p892_p10 }
 0x15b   : > { %p701_p13 = por %p700_p3, %p699_p7 }
 0x15c   : > { %p697_p2 = pneg %p696_p1 }
 0x15d   : > { %p703_p6 = por %p702_p4, %p701_p13 }
 0x15f   : > { %p704_p8 = pnand %p703_p6, %p697_p2 }
 0x161   : > { %707 = shalt.err (!%p704_p8)
}
 0x162   : > { %550 = dma.vmem_to_hbm [thread:$0]  (%p892_p10), %s973_s10, 128, %s971_s29, %s334_s6  }
 0x163 PF: > { %s360_s22 = sand.u32 1, %s746_s12   ;;  %p1041_p12 = scmp.ne.s32.totalorder %s1031_s23, 0 }
 0x164   : > { %p1042_p11 = scmp.ge.s32.totalorder %s766_s17, 2  ;;  %s361_s24 = scalar_lea.sflag [#allocation4], %s360_s22 }
 0x166   : > { %p561_p0 = pnand %p1042_p11, %p1041_p12 }
 0x168   : > { %741 = dma.done.wait (!%p561_p0), %s361_s24, 128  }
 0x169   : > { %743 = vsyncadd (!%p561_p0), %s361_s24, 4294967168  ;;  %s20_s17 = sadd.s32 1, %s766_s17   ;;  %s1043_s12 = smov %s750_s13 }
 0x16a   : > { %p17_p5 = scmp.ge.s32.totalorder %s20_s17, 4   ;;  %s1044_s13 = smov %s754_s14 }
 0x16b   : > { %s1045_s14 = smov %s901_s5  ;;  %s1046_s15 = smov %s762_s16 }
 0x16c   : > { %s1047_s16 = smov %s1049_s28  ;;  %19 = sbr.rel (!%p17_p5) target bundleno = 7 (0x7), region = 85 }
 0x173   :  { %366 = vsyncpa [#allocation3], 1 }
 0x174   :  { %368 = vsyncpa [#allocation3 + $0x1], 1 }
 0x175   :  { %369 = vsyncpa [#allocation6], 1 }
 0x176   :  { %370 = vsyncpa [#allocation4], 1 }
 0x177   :  { %372 = vsyncpa [#allocation4 + $0x1], 1 }

</bundles_post_ra>
